<compile_context>
chip_gen: v5e
topology: v5e:2x2
jax: 0.10.0
libtpu: 0.0.40
codegen_flags: <defaults>
</compile_context>

<pallas_src>
import jax
import jax.numpy as jnp
from jax.experimental import pallas as pl
from jax.experimental.pallas import tpu as pltpu


_NEG_BIG = -1e30  # sentinel bias for padded label columns (can never win the max)


def _round_up(x, m):
    return ((x + m - 1) // m) * m


def _vmem_limit_bytes():
    """Scoped-VMEM budget: ~3/4 of physical VMEM, capped at 96 MiB.

    -> ~48 MiB on v7x (64 MiB physical), 96 MiB on v5e/v6e (128 MiB physical).
    """
    phys = 64 * 1024 * 1024  # conservative default (v7x per-TC VMEM)
    try:
        phys = int(getattr(pltpu.get_tpu_info(), "vmem_capacity_bytes", phys))
    except Exception:
        pass
    return min((phys * 3) // 4, 96 * 1024 * 1024)


# --------------------------------- kernels -----------------------------------

def _bow_kernel_single(x_ref, wt_ref, b_ref, o_ref):
    """Fast path: whole vocab in one tile -> single MXU dot, no accumulator.

    x_ref:  (TB, VP)  bf16   wt_ref: (VP, LP) bf16   b_ref: (1, LP) f32
    o_ref:  (TB, 128) f32    lane-dense output slab
    """
    logits = jnp.dot(x_ref[...], wt_ref[...],
                     preferred_element_type=jnp.float32) + b_ref[...]
    # sigmoid is strictly increasing -> max first, one transcendental per row.
    row_max = jnp.max(logits, axis=1, keepdims=True)              # (TB, 1)
    o_ref[...] = jnp.broadcast_to(jax.nn.sigmoid(row_max), o_ref.shape)


def _make_tiled_kernel(tv, w_resident):
    """Tiled vocab reduction. W^T either VMEM-resident (sliced in-kernel with
    pl.ds) or streamed one (tv, LP) tile per vocab step."""

    def kernel(x_ref, wt_ref, b_ref, o_ref, acc_ref):
        k = pl.program_id(1)

        @pl.when(k == 0)
        def _():
            acc_ref[...] = jnp.zeros_like(acc_ref)

        if w_resident:
            off = pl.multiple_of(k * tv, tv)
            w_tile = wt_ref[pl.ds(off, tv), :]
        else:
            w_tile = wt_ref[...]

        acc_ref[...] += jnp.dot(x_ref[...], w_tile,
                                preferred_element_type=jnp.float32)

        @pl.when(k == pl.num_programs(1) - 1)
        def _():
            logits = acc_ref[...] + b_ref[...]                    # (TB, LP) f32
            row_max = jnp.max(logits, axis=1, keepdims=True)      # (TB, 1)
            o_ref[...] = jnp.broadcast_to(jax.nn.sigmoid(row_max), o_ref.shape)

    return kernel


# --------------------------------- wrapper -----------------------------------

def bow_classifier_forward(x, weight, bias, *, batch_tile=256, vocab_tile=2048,
                           resident_weight=None):
    """x: (B, V) f32, weight: (L, V) f32 (nn.Linear layout), bias: (L,) f32.

    Returns (B,) f32 == torch.max(sigmoid(x @ W^T + b), dim=1)[0].
    resident_weight: None = auto (fit to VMEM budget), True/False = force.
    """
    B, V = x.shape
    L = weight.shape[0]

    vmem_limit = _vmem_limit_bytes()

    # ---- tile sizing --------------------------------------------------------
    tb = min(_round_up(batch_tile, 8), _round_up(B, 8))
    # Keep >= 2 batch tiles when B is big enough so the "parallel" batch axis
    # can shard across v7x's two TensorCores (no-op for tiny B).
    if B > 8 and _round_up(B, tb) == tb and tb > 8:
        tb = max(8, _round_up(tb // 2, 8))
    b_pad = _round_up(B, tb)

    tv = min(_round_up(vocab_tile, 128), _round_up(V, 128))
    v_pad = _round_up(V, tv)
    l_pad = _round_up(L, 128)        # keep lanes at 128; wider = dead bytes only

    n_b = b_pad // tb
    n_k = v_pad // tv

    # Fast path viability check (double-buffered x tile + W + out + bias).
    single_est = (2 * tb * v_pad * 2 + 2 * v_pad * l_pad * 2
                  + 2 * tb * 128 * 4 + 2 * l_pad * 4)
    use_single = (n_k == 1) and (single_est + (4 << 20) <= vmem_limit)
    if n_k == 1 and not use_single:
        # Requested single tile would blow VMEM: shrink tv and go tiled.
        tv = min(tv, 2048)
        v_pad = _round_up(V, tv)
        n_k = v_pad // tv

    # ---- pad + cast (bf16 BEFORE padding -> single cheap pad pass) ----------
    x_b = x.astype(jnp.bfloat16)
    if (b_pad, v_pad) != (B, V):
        x_b = jnp.pad(x_b, ((0, b_pad - B), (0, v_pad - V)))
    wt_b = weight.T.astype(jnp.bfloat16)
    if (v_pad, l_pad) != (V, L):
        wt_b = jnp.pad(wt_b, ((0, v_pad - V), (0, l_pad - L)))
    b_p = jnp.full((1, l_pad), _NEG_BIG, jnp.float32)
    b_p = b_p.at[0, :L].set(bias.astype(jnp.float32))

    out_shape = jax.ShapeDtypeStruct((b_pad, 128), jnp.float32)
    flops = 2 * b_pad * v_pad * l_pad
    w_bytes = v_pad * l_pad * 2

    if use_single:
        bytes_accessed = x_b.size * 2 + w_bytes + l_pad * 4 + b_pad * 128 * 4
        out = pl.pallas_call(
            _bow_kernel_single,
            out_shape=out_shape,
            grid_spec=pltpu.PrefetchScalarGridSpec(
                num_scalar_prefetch=0,
                grid=(n_b,),
                in_specs=[
                    pl.BlockSpec((tb, v_pad), lambda i: (i, 0)),      # x tile
                    pl.BlockSpec((v_pad, l_pad), lambda i: (0, 0)),   # W^T (resident)
                    pl.BlockSpec((1, l_pad), lambda i: (0, 0)),       # bias
                ],
                out_specs=pl.BlockSpec((tb, 128), lambda i: (i, 0)),
            ),
            compiler_params=pltpu.CompilerParams(
                dimension_semantics=("parallel",),
                vmem_limit_bytes=vmem_limit,
            ),
            cost_estimate=pl.CostEstimate(
                flops=flops, transcendentals=b_pad, bytes_accessed=bytes_accessed),
        )(x_b, wt_b, b_p)
        return out[:B, 0]

    # ---- tiled path: decide whether W^T can live fully in VMEM --------------
    # Conservative estimate: every BlockSpec-managed operand may be
    # double-buffered by the pipeline.
    resident_est = (2 * w_bytes + 2 * tb * tv * 2 + 2 * tb * 128 * 4
                    + tb * l_pad * 4 + 2 * l_pad * 4)
    if resident_weight is None:
        w_resident = resident_est + (4 << 20) <= vmem_limit
    else:
        w_resident = bool(resident_weight)

    if w_resident:
        # Constant block index -> single DMA of the whole W^T for the kernel.
        w_spec = pl.BlockSpec((v_pad, l_pad), lambda i, k: (0, 0))
        w_traffic = w_bytes
    else:
        # Streamed: one (tv, LP) tile per vocab step, re-read per batch tile.
        w_spec = pl.BlockSpec((tv, l_pad), lambda i, k: (k, 0))
        w_traffic = n_b * w_bytes

    bytes_accessed = x_b.size * 2 + w_traffic + l_pad * 4 + b_pad * 128 * 4
    kernel = _make_tiled_kernel(tv, w_resident)

    out = pl.pallas_call(
        kernel,
        out_shape=out_shape,
        grid_spec=pltpu.PrefetchScalarGridSpec(
            num_scalar_prefetch=0,
            grid=(n_b, n_k),
            in_specs=[
                pl.BlockSpec((tb, tv), lambda i, k: (i, k)),          # x tile
                w_spec,                                               # W^T
                pl.BlockSpec((1, l_pad), lambda i, k: (0, 0)),        # bias
            ],
            out_specs=pl.BlockSpec((tb, 128), lambda i, k: (i, 0)),
            scratch_shapes=[pltpu.VMEM((tb, l_pad), jnp.float32)],
        ),
        compiler_params=pltpu.CompilerParams(
            # batch "parallel" (sharded on v7x's 2 TCs), vocab reduction last.
            dimension_semantics=("parallel", "arbitrary"),
            vmem_limit_bytes=vmem_limit,
        ),
        cost_estimate=pl.CostEstimate(
            flops=flops, transcendentals=b_pad, bytes_accessed=bytes_accessed),
    )(x_b, wt_b, b_p)
    return out[:B, 0]


# ----------------------------------- test ------------------------------------

if __name__ == "__main__":
    key = jax.random.PRNGKey(0)

    def ref_fn(x, w, b):
        return jnp.max(jax.nn.sigmoid(x @ w.T + b), axis=1)

    def check(B, V, L, **kw):
        k_x, k_w, k_b = jax.random.split(jax.random.fold_in(key, B * 131 + V), 3)
        x = jax.random.normal(k_x, (B, V), dtype=jnp.float32)
        w = jax.random.normal(k_w, (L, V), dtype=jnp.float32) * 0.05
        b = jax.random.normal(k_b, (L,), dtype=jnp.float32) * 0.05
        out = jax.block_until_ready(bow_classifier_forward(x, w, b, **kw))
        ref = ref_fn(x, w, b)
        assert out.shape == (B,)
        # bf16 matmul operands -> tolerance relaxed vs. f32 reference.
        assert jnp.allclose(out, ref, atol=2e-2, rtol=2e-2), (out, ref)

    # 1) small shapes from the module: single-vocab-tile fast path.
    check(8, 128, 16)
    # 2) tiled vocab reduction, VMEM-resident W^T (grid = 2 batch x 4 vocab).
    check(64, 4096, 16, batch_tile=32, vocab_tile=1024)
    # 3) same shapes, streamed-W fallback path forced.
    check(64, 4096, 16, batch_tile=32, vocab_tile=1024, resident_weight=False)

    print("KERNEL_OK")
</pallas_src>

<mosaic_0001>
module attributes {stable_mosaic.version = 11 : i64} {
  func.func @_bow_kernel_single(%arg0: i32, %arg1: memref<8x128xbf16, #tpu.memory_space<vmem>>, %arg2: memref<128x128xbf16, #tpu.memory_space<vmem>>, %arg3: memref<1x128xf32, #tpu.memory_space<vmem>>, %arg4: memref<8x128xf32, #tpu.memory_space<vmem>>) attributes {dimension_semantics = [#tpu.dimension_semantics<parallel>], iteration_bounds = array<i64: 1>, scalar_prefetch = 0 : i64, scratch_operands = 0 : i64, tpu.core_type = #tpu.core_type<tc>, window_params = [{transform_indices = @transform_0, window_bounds = array<i64: 8, 128>}, {pipeline_mode = #tpu.pipeline_mode<synchronous>, transform_indices = @transform_1, window_bounds = array<i64: 128, 128>}, {pipeline_mode = #tpu.pipeline_mode<synchronous>, transform_indices = @transform_2, window_bounds = array<i64: 1, 128>}, {transform_indices = @transform_3, window_bounds = array<i64: 8, 128>}]} {
    %c0 = arith.constant 0 : index
    %c0_0 = arith.constant 0 : index
    %0 = vector.load %arg1[%c0, %c0_0] : memref<8x128xbf16, #tpu.memory_space<vmem>>, vector<8x128xbf16>
    %c0_1 = arith.constant 0 : index
    %c0_2 = arith.constant 0 : index
    %1 = vector.load %arg2[%c0_1, %c0_2] : memref<128x128xbf16, #tpu.memory_space<vmem>>, vector<128x128xbf16>
    %cst = arith.constant dense<0.000000e+00> : vector<8x128xf32>
    %2 = tpu.matmul %0, %1, %cst {dimension_numbers = #tpu.dot_dimension_numbers<[1], [0], [0], [1], [0, 0, 1, 1], [], []>} : vector<8x128xbf16>, vector<128x128xbf16>, vector<8x128xf32> -> vector<8x128xf32>
    %c0_3 = arith.constant 0 : index
    %c0_4 = arith.constant 0 : index
    %3 = vector.load %arg3[%c0_3, %c0_4] : memref<1x128xf32, #tpu.memory_space<vmem>>, vector<1x128xf32>
    %4 = vector.broadcast %3 : vector<1x128xf32> to vector<8x128xf32>
    %5 = arith.addf %2, %4 : vector<8x128xf32>
    %cst_5 = arith.constant dense<0xFF800000> : vector<8xf32>
    %6 = vector.multi_reduction <maximumf>, %5, %cst_5 [1] : vector<8x128xf32> to vector<8xf32>
    %7 = vector.shape_cast %6 : vector<8xf32> to vector<8x1xf32>
    %8 = arith.negf %7 : vector<8x1xf32>
    %9 = math.exp %8 : vector<8x1xf32>
    %cst_6 = arith.constant 1.000000e+00 : f32
    %10 = vector.broadcast %cst_6 : f32 to vector<8x1xf32>
    %11 = arith.addf %10, %9 : vector<8x1xf32>
    %12 = arith.divf %10, %11 : vector<8x1xf32>
    %13 = vector.shape_cast %12 : vector<8x1xf32> to vector<8x1xf32>
    %14 = vector.broadcast %13 : vector<8x1xf32> to vector<8x128xf32>
    %c0_7 = arith.constant 0 : index
    %c0_8 = arith.constant 0 : index
    %15 = vector.load %arg4[%c0_7, %c0_8] : memref<8x128xf32, #tpu.memory_space<vmem>>, vector<8x128xf32>
    tpu.vector_store %arg4[%c0_7, %c0_8], %14 {strides = array<i32>} : memref<8x128xf32, #tpu.memory_space<vmem>>, vector<8x128xf32>,
    return
  }
  func.func @transform_0(%arg0: i32) -> (i32, i32) {
    %c0_i32 = arith.constant 0 : i32
    %c0_i32_0 = arith.constant 0 : i32
    return %arg0, %c0_i32 : i32, i32
  }
  func.func @transform_1(%arg0: i32) -> (i32, i32) {
    %c0_i32 = arith.constant 0 : i32
    %c0_i32_0 = arith.constant 0 : i32
    %c0_i32_1 = arith.constant 0 : i32
    return %c0_i32, %c0_i32_0 : i32, i32
  }
  func.func @transform_2(%arg0: i32) -> (i32, i32) {
    %c0_i32 = arith.constant 0 : i32
    %c0_i32_0 = arith.constant 0 : i32
    %c0_i32_1 = arith.constant 0 : i32
    return %c0_i32, %c0_i32_0 : i32, i32
  }
  func.func @transform_3(%arg0: i32) -> (i32, i32) {
    %c0_i32 = arith.constant 0 : i32
    %c0_i32_0 = arith.constant 0 : i32
    return %arg0, %c0_i32 : i32, i32
  }
}

</mosaic_0001>

<bundles_post_ra>
// kernel: tpu_custom_call.1
= control target key start
LH: loop header
LB: loop body
LE: loop exit
PB: predicated region body
PF: predicated region fallthrough
CT: control target
= control target key end

     0   :  { %8 = vsyncpa [#allocation3], 0  ;;  %s333_s0 = inlined_call_operand.hbm [shape: bf16[8,128], index: 0, kind: input, shape index: {}]   ;;  %s334_s1 = inlined_call_operand.hbm [shape: bf16[128,128], index: 1, kind: input, shape index: {}]   ;;  %s335_s2 = inlined_call_operand.vmem [shape: f32[1,128], index: 2, kind: input, shape index: {}]   ;;  %s336_s3 = inlined_call_operand.hbm [shape: f32[8,128], index: 3, kind: output, shape index: {}]  }
   0x1   :  { %9 = vsyncpa [#allocation6], 0 }
   0x2   :  { %10 = vsyncpa [#allocation4], 0  ;;  %s16_s14 = sshll.u32 %s333_s0, 4  ;;  %s296_s15 = smov [#allocation2]   ;;  %s17_s14 = int_to_ptr.hbm [resolvable:$true] %s16_s14 }
   0x3   :  { %s18_s16 = sshll.u32 %s296_s15, 4  ;;  %s26_s19 = sshll.u32 %s334_s1, 4  ;;  %s19_s16 = int_to_ptr.vmem [resolvable:$true] %s18_s16  ;;  %s27_s19 = int_to_ptr.hbm [resolvable:$true] %s26_s19 }
   0x4   :  { %21 = dma.hbm_to_vmem [thread:$0]  %s17_s14, 64, %s19_s16, [#allocation3]  }
   0x5   :  { %s297_s20 = smov [#allocation5]   ;;  %s298_s22 = smov 64  }
   0x6   :  { %s28_s21 = sshll.u32 %s297_s20, 4  ;;  %s299_s23 = smov 4   ;;  %s29_s21 = int_to_ptr.vmem [resolvable:$true] %s28_s21 }
   0x7   :  { %34 = dma.hbm_to_vmem [thread:$0]  %s27_s19, 1024, %s29_s21, [#allocation6], %s298_s22, %s298_s22, %s299_s23  }
   0x8   :  { %290 = dma.done.wait [#allocation3], 64  }
   0x9   :  { %291 = vsyncadd [#allocation3], 4294967232 }
   0xa   :  { %292 = dma.done.wait [#allocation6], 1024  }
   0xb   :  { %293 = vsyncadd [#allocation6], 4294966272  ;;  %v207_v0 = vld [vmem:[#allocation5 + $0x38] sm:$0xff]  ;;  %v206_v1 = vld [vmem:[#allocation5 + $0x30] sm:$0xff]  ;;  %s300_s24 = smov [#allocation7]   ;;  %s156_s27 = sshll.u32 %s336_s3, 4  ;;  %s157_s27 = int_to_ptr.hbm [resolvable:$true] %s156_s27 }
   0xc   :  { %114 = vmatpush.bf16.msra.mxu0 %v207_v0  ;;  %v205_v2 = vld [vmem:[#allocation5 + $0x28] sm:$0xff]  ;;  %v204_v3 = vld [vmem:[#allocation5 + $0x20] sm:$0xff]  ;;  %v203_v4 = vld [vmem:[#allocation5 + $0x18] sm:$0xff]  ;;  %s154_s25 = sshll.u32 %s300_s24, 4  ;;  %s155_s25 = int_to_ptr.vmem [resolvable:$true] %s154_s25 }
   0xd   :  { %v202_v5 = vld [vmem:[#allocation5 + $0x10] sm:$0xff]  ;;  %v201_v6 = vld [vmem:[#allocation5 + $0x8] sm:$0xff]  ;;  %v200_v7 = vld [vmem:[#allocation5] sm:$0xff] }
   0xe   :  { %v45_v8 = vld [vmem:[#allocation2] sm:$0xf] }
   0xf   :  { %v213_v9 = vld [vmem:[%s335_s2] ss:$0 sm:$0xff] }
  0x10   :  { %115 = vmatpush.bf16.msra.mxu0 %v206_v1 }
  0x14   :  { %116 = vmatpush.bf16.msra.mxu0 %v205_v2 }
  0x18   :  { %117 = vmatpush.bf16.msra.mxu0 %v204_v3 }
  0x1c   :  { %118 = vmatpush.bf16.msra.mxu0 %v203_v4 }
  0x20   :  { %119 = vmatpush.bf16.msra.mxu0 %v202_v5 }
  0x24   :  { %120 = vmatpush.bf16.msra.mxu0 %v201_v6 }
  0x28   :  { %121 = vmatpush.bf16.msra.mxu0 %v200_v7 }
  0x2b   :  { %122 = vmatmul.bf16.vlgmr.msra.gmra.mxu0 %v45_v8 }
  0xa8   :  { %v123_v10 = vpop.f32.mrf.mxu0 }
  0xa9   :  { %v124_v11 = vadd.f32 %v213_v9, %v123_v10 }
  0xab   :  { %127 = vmax.xlane.f32.xlu0 %v124_v11 }
  0xb0   :  { %v125_v12 = vpop.f32.mrf.mxu0 }
 0x11e   :  { %v128_v13 = vpop.xlane.xlu0 %127 }
 0x11f   :  { %v199_v14 = vmul.f32 -1.442695, %v128_v13 }
 0x121   :  { %214 = vpow2.f32 %v199_v14 }
 0x127   :  { %v215_v15 = vpop.eup %214 }
 0x128   :  { %v132_v16 = vadd.f32 1.0, %v215_v15 }
 0x12a   :  { %216 = vrcp.f32 %v132_v16  ;;  %v144_v20 = vand.u32 2147483648, %v132_v16  ;;  %v142_v22 = vand.u32 2147483647, %v132_v16  ;;  %vm138_vm1 = vweird.f32 %v132_v16 }
 0x12c   :  { %v145_v24 = vor.u32 1.1754944e-38, %v144_v20  ;;  %vm143_vm3 = vcmp.eq.f32.partialorder %v142_v22, 8.507059e+37 }
 0x130   :  { %v217_v17 = vpop.eup %216 }
 0x131   :  { %v134_v18 = vmul.f32 %v217_v17, %v132_v16  ;;  %vm139_vm0 = vweird.f32 %v217_v17 }
 0x132   :  { %vm140_vm2 = vmor %vm138_vm1, %vm139_vm0 }
 0x133   :  { %v135_v19 = vsub.f32 1.0, %v134_v18 }
 0x135   :  { %v136_v21 = vmul.f32 %v217_v17, %v135_v19 }
 0x137   :  { %v137_v23 = vadd.f32 %v217_v17, %v136_v21 }
 0x139   :  { %v141_v25 = vsel %vm140_vm2, %v217_v17, %v137_v23 }
 0x13a   :  { %v146_v26 = vsel %vm143_vm3, %v145_v24, %v141_v25 }
 0x13b   :  { %148 = vst [vmem:[#allocation7] sm:$0xff] %v146_v26 }
 0x13c   :  { %159 = dma.vmem_to_hbm [thread:$0]  %s155_s25, 128, %s157_s27, [#allocation4]  }
 0x13d   :  { %294 = dma.done.wait [#allocation4], 128  }
 0x13e   :  { %295 = vsyncadd [#allocation4], 4294967168 }
 0x13f   :  { %164 = vsyncpa [#allocation3], 1 }
 0x140   :  { %165 = vsyncpa [#allocation6], 1 }
 0x141   :  { %166 = vsyncpa [#allocation4], 1 }

</bundles_post_ra>
